<compile_context>
chip_gen: v7x
topology: tpu7x:2x2x1
jax: 0.10.0
libtpu: 0.0.40
codegen_flags: <defaults>
</compile_context>

<pallas_src>
import functools

import jax
import jax.numpy as jnp
from jax.experimental import pallas as pl
from jax.experimental.pallas import tpu as pltpu

EPS = 1e-5           # torch BatchNorm1d default eps
POS_COMPONENTS = 4   # xx, yy, fx, fy


def _round_up(x, m):
    return (x + m - 1) // m * m


# ----------------------------------------------------------------------------
# Generation-aware defaults (tiles + scoped VMEM limit).
# ----------------------------------------------------------------------------
_GEN_CFG = {
    "v5e":   dict(p_tile=1024, nsp_tile=512, vmem=64 * 1024 * 1024),
    "v6e":   dict(p_tile=2048, nsp_tile=512, vmem=64 * 1024 * 1024),
    "v7x":   dict(p_tile=2048, nsp_tile=512, vmem=48 * 1024 * 1024),
    "other": dict(p_tile=512,  nsp_tile=256, vmem=None),
}


def _tpu_generation():
    try:
        kind = jax.devices()[0].device_kind.lower()
    except Exception:
        return "other"
    if ("v5e" in kind) or ("v5 lite" in kind) or ("v5litepod" in kind):
        return "v5e"
    if "v6" in kind:
        return "v6e"
    if "v7" in kind:
        return "v7x"
    return "other"


def _compiler_params(semantics, vmem_limit):
    kwargs = dict(dimension_semantics=semantics)
    if vmem_limit is not None:
        kwargs["vmem_limit_bytes"] = vmem_limit
    return pltpu.CompilerParams(**kwargs)


def _pick_p_tile(p, p_tile_max):
    """Prefer a 256-multiple tile that divides P exactly: no feats pad copy."""
    t = max(256, (p_tile_max // 256) * 256)
    while t >= 256:
        if p % t == 0:
            return t
        t -= 256
    # fall back: pad at most one tile's worth of pixel rows (full-slab copy)
    return min(max(256, (p_tile_max // 256) * 256), _round_up(p, 256))


def _largest_divisor(n, cap, step=8):
    cap = max(step, min(cap, n))
    cap -= cap % step
    for t in range(cap, step - 1, -step):
        if n % t == 0:
            return t
    return step


# ----------------------------------------------------------------------------
# sp_pool: superpixel average pooling as a tiled one-hot matmul on the MXU.
#   grid = (N_sp tiles [parallel], P tiles [arbitrary])
#   output block index depends only on the N_sp axis -> VMEM-resident acc.
# ----------------------------------------------------------------------------
def _sp_pool_kernel(tmin_ref, tmax_ref, labels_ref, feats_ref, out_ref,
                    cnt_ref, ids_ref):
    i = pl.program_id(0)
    j = pl.program_id(1)
    nsp_tile = out_ref.shape[0]
    base = i * nsp_tile

    @pl.when(j == 0)
    def _():
        out_ref[...] = jnp.zeros_like(out_ref)
        cnt_ref[...] = jnp.zeros_like(cnt_ref)
        # superpixel ids covered by this output tile, pre-broadcast once per i
        ids_ref[...] = base + jax.lax.broadcasted_iota(
            jnp.int32, ids_ref.shape, 0)

    # Labels are spatially coherent: skip (i, j) tile pairs whose prefetched
    # label range does not intersect this output tile.
    hit = jnp.logical_and(tmax_ref[j] >= base, tmin_ref[j] < base + nsp_tile)

    @pl.when(hit)
    def _():
        # one-hot mask, built pre-transposed: (nsp_tile, p_tile); padded pixels
        # carry label -1 so their columns are all-zero.
        mask = jnp.where(labels_ref[...] == ids_ref[...], 1.0, 0.0)  # exact f32
        # pixel counts: cross-lane reduce on the XLU (free slot next to the MXU)
        cnt_ref[...] += jnp.sum(mask, axis=-1, keepdims=True)
        # bf16 MXU matmul, f32 accumulation straight into the resident output
        out_ref[...] += jnp.dot(mask.astype(jnp.bfloat16),
                                feats_ref[...].astype(jnp.bfloat16),
                                preferred_element_type=jnp.float32)

    @pl.when(j == pl.num_programs(1) - 1)
    def _():
        # empty / padded superpixels are guarded to count 1 -> zero mean vector
        inv = 1.0 / jnp.maximum(cnt_ref[...], 1.0)   # exact, once per i
        out_ref[...] = out_ref[...] * inv


def sp_pool(feats_flat, labels_flat, n_sp, *, p_tile=None, nsp_tile=None):
    """Mean-pool per-pixel features (P, C) into per-superpixel means.

    Returns the row-padded (n_sp_pad, C) float32 slab; rows >= n_sp are zeros.
    """
    gen = _tpu_generation()
    cfg = _GEN_CFG[gen]
    p, c = feats_flat.shape

    if p_tile is None:
        p_tile = _pick_p_tile(p, cfg["p_tile"])
    else:
        p_tile = max(256, _round_up(p_tile, 256))
    p_pad = _round_up(p, p_tile)

    if nsp_tile is None:
        nsp_tile = min(cfg["nsp_tile"], _round_up(n_sp, 8))
        if gen == "v7x" and nsp_tile >= n_sp and n_sp > 8:
            # keep the "parallel" superpixel axis >= 2 tiles for the 2 TCs
            nsp_tile = _round_up((n_sp + 1) // 2, 8)
    nsp_tile = max(8, _round_up(nsp_tile, 8))
    n_sp_pad = _round_up(n_sp, nsp_tile)

    grid_i = n_sp_pad // nsp_tile
    grid_j = p_pad // p_tile

    # labels: tiny int32 pad with -1 (padded pixels contribute nothing)
    labels_b = labels_flat.astype(jnp.int32).reshape(1, p)
    if p_pad != p:
        labels_b = jnp.pad(labels_b, ((0, 0), (0, p_pad - p)),
                           constant_values=-1)
        # feats pad is a full-slab copy; only taken when no tile divides P.
        feats_flat = jnp.pad(feats_flat, ((0, p_pad - p), (0, 0)))

    # No ones-column / lane-pad / cast pass over the feature slab: counts and
    # the bf16 cast happen in-kernel.  Only when the slab is re-streamed >2x
    # (feats' index_map ignores the superpixel-tile axis) pre-cast to bf16 to
    # halve the repeated HBM reads.
    feats_in = feats_flat if grid_i <= 2 else feats_flat.astype(jnp.bfloat16)

    # per-P-tile label range -> scalar-prefetched tile-skip table
    lab_tiles = labels_b.reshape(grid_j, p_tile)
    tmin = jnp.min(lab_tiles, axis=1).astype(jnp.int32)
    tmax = jnp.max(lab_tiles, axis=1).astype(jnp.int32)

    return pl.pallas_call(
        _sp_pool_kernel,
        out_shape=jax.ShapeDtypeStruct((n_sp_pad, c), jnp.float32),
        grid_spec=pltpu.PrefetchScalarGridSpec(
            num_scalar_prefetch=2,
            grid=(grid_i, grid_j),
            in_specs=[pl.BlockSpec((1, p_tile), lambda i, j, *_: (0, j)),
                      pl.BlockSpec((p_tile, c), lambda i, j, *_: (j, 0))],
            out_specs=pl.BlockSpec((nsp_tile, c), lambda i, j, *_: (i, 0)),
            scratch_shapes=[pltpu.VMEM((nsp_tile, 1), jnp.float32),
                            pltpu.VMEM((nsp_tile, p_tile), jnp.int32)],
        ),
        compiler_params=_compiler_params(("parallel", "arbitrary"), cfg["vmem"]),
    )(tmin, tmax, labels_b, feats_in)


# ----------------------------------------------------------------------------
# LocMotionAppearance forward: two N-tiled kernels with global BN statistics.
# ----------------------------------------------------------------------------
def _locmotion_stage1_kernel(x_ref, mean_ref, invstd_ref,
                             wc1_ref, bc1_ref, wc2_ref, bc2_ref,
                             ws1_ref, bs1_ref,
                             c2_ref, s1p_ref):
    # bn_coords + bn_reduc fused: per-column standardisation of the full slab
    xn = (x_ref[...] - mean_ref[...]) * invstd_ref[...]

    # coords path: Conv1d(4,32,k=1) -> Dropout(id) -> Conv1d(32,64,k=1) -> ReLU
    cn = xn[:, :POS_COMPONENTS]
    c1 = jnp.dot(cn, wc1_ref[...], preferred_element_type=jnp.float32) + bc1_ref[...]
    c2 = jnp.dot(c1, wc2_ref[...], preferred_element_type=jnp.float32) + bc2_ref[...]
    c2_ref[...] = jnp.maximum(c2, 0.0)

    # skips path (pre-BN): Conv1d(256,512,k=1) -> Dropout(id).  ws1 is stored
    # zero-padded over the coord columns so the whole slab can be matmul'd
    # without a lane slice of the skip columns.
    s1p_ref[...] = jnp.dot(xn.astype(jnp.bfloat16), ws1_ref[...],
                           preferred_element_type=jnp.float32) + bs1_ref[...]


def _locmotion_stage2_kernel(c2_ref, s1p_ref, mean1_ref, invstd1_ref,
                             wm_c_ref, wm_s_ref, bm_ref, siam_ref):
    # BN(512) with the globally computed (two-pass) stats -> ReLU
    s1 = jnp.maximum((s1p_ref[...] - mean1_ref[...]) * invstd1_ref[...], 0.0)
    # merger2: Dropout(id) -> Linear(64 + 512 -> 256); concat as a split matmul
    siam_ref[...] = (jnp.dot(c2_ref[...].astype(jnp.bfloat16), wm_c_ref[...],
                             preferred_element_type=jnp.float32)
                     + jnp.dot(s1.astype(jnp.bfloat16), wm_s_ref[...],
                               preferred_element_type=jnp.float32)
                     + bm_ref[...])


def _bn_stats(x):
    # training-mode BatchNorm1d statistics: biased variance, eps=1e-5
    mean = jnp.mean(x, axis=0, keepdims=True)
    var = jnp.mean(jnp.square(x - mean), axis=0, keepdims=True)
    return mean, jax.lax.rsqrt(var + EPS)


def locmotion_forward(pooled_pad, n_valid, params, *, n_tile=None):
    """LocMotionAppearance on the row-padded pooled slab (n_pad, 4 + skip_dims)."""
    gen = _tpu_generation()
    n_pad, c = pooled_pad.shape
    if n_tile is None:
        cap = 1024
        if gen == "v7x" and n_pad >= 16:
            cap = min(cap, n_pad // 2)       # >= 2 tiles for the two v7x TCs
        n_tile = _largest_divisor(n_pad, cap)
    grid = (n_pad // n_tile,)
    cparams = _compiler_params(("parallel",), _GEN_CFG[gen]["vmem"])

    def row_spec(width):
        return pl.BlockSpec((n_tile, width), lambda i: (i, 0))

    def full_spec(a):
        return pl.BlockSpec(a.shape, lambda i: tuple(0 for _ in a.shape))

    # pass 0 (cheap wrapper XLA reductions): global bn_coords / bn_reduc stats
    mean0, invstd0 = _bn_stats(pooled_pad[:n_valid])

    s1_in = (pooled_pad, mean0, invstd0,
             params["wc1"], params["bc1"], params["wc2"], params["bc2"],
             params["ws1"], params["bs1"])
    c2, s1p = pl.pallas_call(
        _locmotion_stage1_kernel,
        out_shape=(jax.ShapeDtypeStruct((n_pad, 64), jnp.float32),
                   jax.ShapeDtypeStruct((n_pad, 512), jnp.float32)),
        grid=grid,
        in_specs=[row_spec(c)] + [full_spec(a) for a in s1_in[1:]],
        out_specs=(row_spec(64), row_spec(512)),
        compiler_params=cparams,
    )(*s1_in)

    # pass between stages: global BN(512) stats of the pre-activation
    mean1, invstd1 = _bn_stats(s1p[:n_valid])

    s2_in = (c2, s1p, mean1, invstd1,
             params["wm_c"], params["wm_s"], params["bm"])
    siam = pl.pallas_call(
        _locmotion_stage2_kernel,
        out_shape=jax.ShapeDtypeStruct((n_pad, 256), jnp.float32),
        grid=grid,
        in_specs=[row_spec(64), row_spec(512)] + [full_spec(a) for a in s2_in[2:]],
        out_specs=row_spec(256),
        compiler_params=cparams,
    )(*s2_in)
    return siam


# ----------------------------------------------------------------------------
# Parameter init (xavier_uniform for Conv1d / Linear with bias, bias = 0),
# matching LocMotionAppearance.__init__.
# ----------------------------------------------------------------------------
def _xavier_uniform(key, fan_in, fan_out):
    limit = (6.0 / (fan_in + fan_out)) ** 0.5
    return jax.random.uniform(key, (fan_in, fan_out), jnp.float32, -limit, limit)


def init_params(key, skip_dims=256):
    ks = jax.random.split(key, 4)
    wc1 = _xavier_uniform(ks[0], POS_COMPONENTS, 32)
    wc2 = _xavier_uniform(ks[1], 32, 64)
    ws1 = _xavier_uniform(ks[2], skip_dims, 512)
    wm = _xavier_uniform(ks[3], 64 + 512, 256)
    ws1_full = jnp.concatenate(
        [jnp.zeros((POS_COMPONENTS, 512), jnp.float32), ws1], axis=0)
    return {
        "wc1": wc1, "bc1": jnp.zeros((1, 32), jnp.float32),
        "wc2": wc2, "bc2": jnp.zeros((1, 64), jnp.float32),
        "ws1": ws1_full.astype(jnp.bfloat16),
        "bs1": jnp.zeros((1, 512), jnp.float32),
        "wm_c": wm[:64, :].astype(jnp.bfloat16),
        "wm_s": wm[64:, :].astype(jnp.bfloat16),
        "bm": jnp.zeros((1, 256), jnp.float32),
    }


# ----------------------------------------------------------------------------
# Glue (plain JAX): coord maps, label linearization, references for checking.
# ----------------------------------------------------------------------------
def make_coord_map(batch_size, w, h):
    # Mirrors the PyTorch helper's call convention (w = image H, h = image W);
    # degenerate for size-1 spatial dims (same as the original).
    xx = jnp.broadcast_to(jnp.arange(w, dtype=jnp.float32)[:, None] / (w - 1), (w, h))
    yy = jnp.broadcast_to(jnp.arange(h, dtype=jnp.float32)[None, :] / (h - 1), (w, h))
    xx = jnp.broadcast_to(xx[None, None], (batch_size, 1, w, h))
    yy = jnp.broadcast_to(yy[None, None], (batch_size, 1, w, h))
    return xx, yy


def linearize_labels(labels, sp_per_image):
    b = labels.shape[0]
    offs = (jnp.arange(b, dtype=jnp.int32) * sp_per_image)[:, None, None]
    return labels.astype(jnp.int32) + offs


def sp_pool_ref(feats, labels, n_sp):
    sums = jax.ops.segment_sum(feats, labels, num_segments=n_sp)
    cnts = jax.ops.segment_sum(jnp.ones((feats.shape[0],), feats.dtype),
                               labels, num_segments=n_sp)
    return sums / jnp.maximum(cnts, 1.0)[:, None]


def locmotion_ref(pooled, params):
    hi = jax.lax.Precision.HIGHEST

    def bn(x):
        m = jnp.mean(x, axis=0, keepdims=True)
        v = jnp.mean(jnp.square(x - m), axis=0, keepdims=True)
        return (x - m) * jax.lax.rsqrt(v + EPS)

    xn = bn(pooled)
    c = jnp.dot(xn[:, :POS_COMPONENTS], params["wc1"], precision=hi) + params["bc1"]
    c = jnp.maximum(jnp.dot(c, params["wc2"], precision=hi) + params["bc2"], 0.0)
    s = jnp.dot(xn, params["ws1"].astype(jnp.float32), precision=hi) + params["bs1"]
    s = jnp.maximum(bn(s), 0.0)
    return (jnp.dot(c, params["wm_c"].astype(jnp.float32), precision=hi)
            + jnp.dot(s, params["wm_s"].astype(jnp.float32), precision=hi)
            + params["bm"])


if __name__ == "__main__":
    key = jax.random.PRNGKey(0)
    B, H, W = 2, 16, 24        # non-square to exercise the coord-map handling
    SKIP_DIMS = 256            # skip_dims default of LocMotionAppearance
    SP_H = SP_W = 4            # synthetic superpixels: 4x4 pixel blocks
    SP_PER_IMG = (H // SP_H) * (W // SP_W)     # 24
    N_SP = B * SP_PER_IMG                      # 48

    k_fx, k_fy, k_feats, k_par = jax.random.split(key, 4)
    fx = jax.random.normal(k_fx, (B, 1, H, W), jnp.float32)
    fy = jax.random.normal(k_fy, (B, 1, H, W), jnp.float32)
    # synthetic stand-in for res['skips'][-1] (encoder bottleneck features)
    autoenc_feats = jax.random.normal(k_feats, (B, SKIP_DIMS, H, W), jnp.float32)

    # synthetic superpixel labels: 4x4 pixel blocks
    ii = jnp.arange(H)[:, None] // SP_H
    jj = jnp.arange(W)[None, :] // SP_W
    labels = jnp.broadcast_to(
        (ii * (W // SP_W) + jj).astype(jnp.int32)[None], (B, H, W))
    labels_lin = linearize_labels(labels, SP_PER_IMG)

    # call convention matches PyTorch forward: (batch, image.shape[2], image.shape[3])
    coord_xx, coord_yy = make_coord_map(B, H, W)                         # (B,1,H,W)

    # assemble per-pixel features [xx, yy, fx, fy, autoenc_feats] and pool once
    feat_img = jnp.concatenate([coord_xx, coord_yy, fx, fy, autoenc_feats], axis=1)
    C_all = feat_img.shape[1]                                            # 4 + 256
    feats_flat = jnp.transpose(feat_img, (0, 2, 3, 1)).reshape(B * H * W, C_all)
    labels_flat = labels_lin.reshape(B * H * W)

    pooled_pad = sp_pool(feats_flat, labels_flat, N_SP)      # (n_sp_pad, 260)
    params = init_params(k_par, SKIP_DIMS)
    siam_pad = locmotion_forward(pooled_pad, N_SP, params)   # (n_sp_pad, 256)

    siam_feats = siam_pad[:N_SP]
    pos = pooled_pad[:N_SP, :2]             # torch.stack((xx, yy)).T, in wrapper

    res = {
        'siam_feats': siam_feats,                 # (N_SP, 256)
        'pos': pos,                               # (N_SP, 2)
        'pos_x': pooled_pad[:N_SP, 0],            # sp_pool(coord_xx, labels)
        'pos_y': pooled_pad[:N_SP, 1],            # sp_pool(coord_yy, labels)
        'pooled_feats_stub': pooled_pad[:N_SP, POS_COMPONENTS:],
    }
    jax.block_until_ready(res)

    assert res['siam_feats'].shape == (N_SP, 256)
    assert res['pos'].shape == (N_SP, 2)
    assert bool(jnp.all(jnp.isfinite(res['siam_feats'])))
    assert bool(jnp.all(jnp.isfinite(pooled_pad)))

    # correctness vs. pure-JAX references (generous tolerances: bf16 MXU path)
    pooled_ref = sp_pool_ref(feats_flat, labels_flat, N_SP)
    err_pool = float(jnp.max(jnp.abs(pooled_pad[:N_SP] - pooled_ref)))
    siam_ref = locmotion_ref(pooled_pad[:N_SP], params)
    err_siam = float(jnp.max(jnp.abs(siam_feats - siam_ref)))
    assert err_pool < 5e-2, f"sp_pool max abs err {err_pool}"
    assert err_siam < 2.5e-1, f"locmotion max abs err {err_siam}"

    print("KERNEL_OK")
</pallas_src>

<mosaic_0001>
module attributes {stable_mosaic.version = 11 : i64} {
  func.func @_sp_pool_kernel(%arg0: i32, %arg1: i32, %arg2: memref<3xi32, #tpu.memory_space<smem>>, %arg3: memref<3xi32, #tpu.memory_space<smem>>, %arg4: memref<1x256xi32, #tpu.memory_space<vmem>>, %arg5: memref<256x260xf32, #tpu.memory_space<vmem>>, %arg6: memref<48x260xf32, #tpu.memory_space<vmem>>, %arg7: memref<48x1xf32, #tpu.memory_space<vmem>>, %arg8: memref<48x256xi32, #tpu.memory_space<vmem>>) attributes {dimension_semantics = [#tpu.dimension_semantics<parallel>, #tpu.dimension_semantics<arbitrary>], iteration_bounds = array<i64: 1, 3>, scalar_prefetch = 2 : i64, scratch_operands = 2 : i64, tpu.core_type = #tpu.core_type<tc>, window_params = [{transform_indices = @transform_0, window_bounds = array<i64: 1, 256>}, {transform_indices = @transform_1, window_bounds = array<i64: 256, 260>}, {transform_indices = @transform_2, window_bounds = array<i64: 48, 260>}]} {
    %c48_i32 = arith.constant 48 : i32
    %0 = arith.muli %arg0, %c48_i32 : i32
    %c0_i32 = arith.constant 0 : i32
    %1 = arith.cmpi eq, %arg1, %c0_i32 : i32
    %2 = arith.extui %1 : i1 to i32
    %c0_i32_0 = arith.constant 0 : i32
    %3 = arith.cmpi ne, %2, %c0_i32_0 : i32
    scf.if %3 {
      %cst = arith.constant 0.000000e+00 : f32
      %17 = vector.broadcast %cst : f32 to vector<48x260xf32>
      %c0 = arith.constant 0 : index
      %c0_4 = arith.constant 0 : index
      %18 = vector.load %arg6[%c0, %c0_4] : memref<48x260xf32, #tpu.memory_space<vmem>>, vector<48x260xf32>
      tpu.vector_store %arg6[%c0, %c0_4], %17 {strides = array<i32>} : memref<48x260xf32, #tpu.memory_space<vmem>>, vector<48x260xf32>,
      %cst_5 = arith.constant 0.000000e+00 : f32
      %19 = vector.broadcast %cst_5 : f32 to vector<48x1xf32>
      %c0_6 = arith.constant 0 : index
      %c0_7 = arith.constant 0 : index
      %20 = vector.load %arg7[%c0_6, %c0_7] : memref<48x1xf32, #tpu.memory_space<vmem>>, vector<48x1xf32>
      tpu.vector_store %arg7[%c0_6, %c0_7], %19 {strides = array<i32>} : memref<48x1xf32, #tpu.memory_space<vmem>>, vector<48x1xf32>,
      %21 = tpu.iota {dimensions = array<i32: 0>} : vector<48x256xi32>
      %22 = vector.broadcast %0 : i32 to vector<48x256xi32>
      %23 = arith.addi %22, %21 : vector<48x256xi32>
      %c0_8 = arith.constant 0 : index
      %c0_9 = arith.constant 0 : index
      %24 = vector.load %arg8[%c0_8, %c0_9] : memref<48x256xi32, #tpu.memory_space<vmem>>, vector<48x256xi32>
      tpu.vector_store %arg8[%c0_8, %c0_9], %23 {strides = array<i32>} : memref<48x256xi32, #tpu.memory_space<vmem>>, vector<48x256xi32>,
    } else {
    }
    %4 = arith.index_cast %arg1 : i32 to index
    %5 = memref.load %arg3[%4] : memref<3xi32, #tpu.memory_space<smem>>
    %6 = arith.cmpi sge, %5, %0 : i32
    %7 = arith.index_cast %arg1 : i32 to index
    %8 = memref.load %arg2[%7] : memref<3xi32, #tpu.memory_space<smem>>
    %c48_i32_1 = arith.constant 48 : i32
    %9 = arith.addi %0, %c48_i32_1 : i32
    %10 = arith.cmpi slt, %8, %9 : i32
    %11 = arith.andi %6, %10 : i1
    %12 = arith.extui %11 : i1 to i32
    %c0_i32_2 = arith.constant 0 : i32
    %13 = arith.cmpi ne, %12, %c0_i32_2 : i32
    scf.if %13 {
      %c0 = arith.constant 0 : index
      %c0_4 = arith.constant 0 : index
      %17 = vector.load %arg4[%c0, %c0_4] : memref<1x256xi32, #tpu.memory_space<vmem>>, vector<1x256xi32>
      %c0_5 = arith.constant 0 : index
      %c0_6 = arith.constant 0 : index
      %18 = vector.load %arg8[%c0_5, %c0_6] : memref<48x256xi32, #tpu.memory_space<vmem>>, vector<48x256xi32>
      %19 = vector.broadcast %17 : vector<1x256xi32> to vector<48x256xi32>
      %20 = arith.cmpi eq, %19, %18 : vector<48x256xi32>
      %cst = arith.constant 1.000000e+00 : f32
      %cst_7 = arith.constant 0.000000e+00 : f32
      %21 = vector.broadcast %cst : f32 to vector<48x256xf32>
      %22 = vector.broadcast %cst_7 : f32 to vector<48x256xf32>
      %23 = arith.select %20, %21, %22 : vector<48x256xi1>, vector<48x256xf32>
      %c0_8 = arith.constant 0 : index
      %c0_9 = arith.constant 0 : index
      %24 = vector.load %arg7[%c0_8, %c0_9] : memref<48x1xf32, #tpu.memory_space<vmem>>, vector<48x1xf32>
      %cst_10 = arith.constant dense<0.000000e+00> : vector<48xf32>
      %25 = vector.multi_reduction <add>, %23, %cst_10 [1] : vector<48x256xf32> to vector<48xf32>
      %26 = vector.shape_cast %25 : vector<48xf32> to vector<48x1xf32>
      %27 = arith.addf %24, %26 : vector<48x1xf32>
      %c0_11 = arith.constant 0 : index
      %c0_12 = arith.constant 0 : index
      %28 = vector.load %arg7[%c0_11, %c0_12] : memref<48x1xf32, #tpu.memory_space<vmem>>, vector<48x1xf32>
      tpu.vector_store %arg7[%c0_11, %c0_12], %27 {strides = array<i32>} : memref<48x1xf32, #tpu.memory_space<vmem>>, vector<48x1xf32>,
      %c0_13 = arith.constant 0 : index
      %c0_14 = arith.constant 0 : index
      %29 = vector.load %arg6[%c0_13, %c0_14] : memref<48x260xf32, #tpu.memory_space<vmem>>, vector<48x260xf32>
      %30 = arith.truncf %23 : vector<48x256xf32> to vector<48x256xbf16>
      %c0_15 = arith.constant 0 : index
      %c0_16 = arith.constant 0 : index
      %31 = vector.load %arg5[%c0_15, %c0_16] : memref<256x260xf32, #tpu.memory_space<vmem>>, vector<256x260xf32>
      %32 = arith.truncf %31 : vector<256x260xf32> to vector<256x260xbf16>
      %cst_17 = arith.constant dense<0.000000e+00> : vector<48x260xf32>
      %33 = tpu.matmul %30, %32, %cst_17 {dimension_numbers = #tpu.dot_dimension_numbers<[1], [0], [0], [1], [0, 0, 1, 1], [], []>} : vector<48x256xbf16>, vector<256x260xbf16>, vector<48x260xf32> -> vector<48x260xf32>
      %34 = arith.addf %29, %33 : vector<48x260xf32>
      %c0_18 = arith.constant 0 : index
      %c0_19 = arith.constant 0 : index
      %35 = vector.load %arg6[%c0_18, %c0_19] : memref<48x260xf32, #tpu.memory_space<vmem>>, vector<48x260xf32>
      tpu.vector_store %arg6[%c0_18, %c0_19], %34 {strides = array<i32>} : memref<48x260xf32, #tpu.memory_space<vmem>>, vector<48x260xf32>,
    } else {
    }
    %c2_i32 = arith.constant 2 : i32
    %14 = arith.cmpi eq, %arg1, %c2_i32 : i32
    %15 = arith.extui %14 : i1 to i32
    %c0_i32_3 = arith.constant 0 : i32
    %16 = arith.cmpi ne, %15, %c0_i32_3 : i32
    scf.if %16 {
      %c0 = arith.constant 0 : index
      %c0_4 = arith.constant 0 : index
      %17 = vector.load %arg7[%c0, %c0_4] : memref<48x1xf32, #tpu.memory_space<vmem>>, vector<48x1xf32>
      %cst = arith.constant 1.000000e+00 : f32
      %18 = vector.broadcast %cst : f32 to vector<48x1xf32>
      %19 = arith.maximumf %17, %18 : vector<48x1xf32>
      %cst_5 = arith.constant 1.000000e+00 : f32
      %20 = vector.broadcast %cst_5 : f32 to vector<48x1xf32>
      %21 = arith.divf %20, %19 : vector<48x1xf32>
      %c0_6 = arith.constant 0 : index
      %c0_7 = arith.constant 0 : index
      %22 = vector.load %arg6[%c0_6, %c0_7] : memref<48x260xf32, #tpu.memory_space<vmem>>, vector<48x260xf32>
      %23 = vector.broadcast %21 : vector<48x1xf32> to vector<48x260xf32>
      %24 = arith.mulf %22, %23 : vector<48x260xf32>
      %c0_8 = arith.constant 0 : index
      %c0_9 = arith.constant 0 : index
      %25 = vector.load %arg6[%c0_8, %c0_9] : memref<48x260xf32, #tpu.memory_space<vmem>>, vector<48x260xf32>
      tpu.vector_store %arg6[%c0_8, %c0_9], %24 {strides = array<i32>} : memref<48x260xf32, #tpu.memory_space<vmem>>, vector<48x260xf32>,
    } else {
    }
    return
  }
  func.func @transform_0(%arg0: i32, %arg1: i32, %arg2: memref<3xi32, #tpu.memory_space<smem>>, %arg3: memref<3xi32, #tpu.memory_space<smem>>) -> (i32, i32) {
    %c0_i32 = arith.constant 0 : i32
    %c0_i32_0 = arith.constant 0 : i32
    return %c0_i32, %arg1 : i32, i32
  }
  func.func @transform_1(%arg0: i32, %arg1: i32, %arg2: memref<3xi32, #tpu.memory_space<smem>>, %arg3: memref<3xi32, #tpu.memory_space<smem>>) -> (i32, i32) {
    %c0_i32 = arith.constant 0 : i32
    %c0_i32_0 = arith.constant 0 : i32
    return %arg1, %c0_i32 : i32, i32
  }
  func.func @transform_2(%arg0: i32, %arg1: i32, %arg2: memref<3xi32, #tpu.memory_space<smem>>, %arg3: memref<3xi32, #tpu.memory_space<smem>>) -> (i32, i32) {
    %c0_i32 = arith.constant 0 : i32
    %c0_i32_0 = arith.constant 0 : i32
    return %arg0, %c0_i32 : i32, i32
  }
}

</mosaic_0001>

<bundles_post_ra>
// kernel: tpu_custom_call.1
= control target key start
LH: loop header
LB: loop body
LE: loop exit
PB: predicated region body
PF: predicated region fallthrough
CT: control target
= control target key end

     0   :  { %s1493_s0 = inlined_call_operand.vmem [shape: s32[3], index: 0, kind: input, shape index: {}]   ;;  %s1494_s2 = inlined_call_operand.vmem [shape: s32[1,768], index: 2, kind: input, shape index: {}]   ;;  %s1495_s3 = inlined_call_operand.vmem [shape: f32[768,260], index: 3, kind: input, shape index: {}]   ;;  %s1496_s4 = inlined_call_operand.hbm [shape: f32[48,260], index: 4, kind: output, shape index: {}]   ;;  %s1497_s1 = inlined_call_operand.vmem [shape: s32[3], index: 1, kind: input, shape index: {}]  }
   0x1   :  { %s9_s17 = sshll.u32 %s1493_s0, 4  ;;  %s13_s20 = sshll.u32 %s1497_s1, 4  ;;  %s10_s17 = int_to_ptr.vmem [resolvable:$true] %s9_s17  ;;  %s14_s20 = int_to_ptr.vmem [resolvable:$true] %s13_s20 }
   0x2   :  { %s968_s21 = scalar_lea.vmem %s10_s17, 16  ;;  %p973_p1 = scmp.lt.s32.totalorder %s10_s17, %s10_s17 }
   0x3   :  { %p969_p0 = scmp.ne.s32.totalorder %s10_s17, %s968_s21  ;;  %p974_p2 = scmp.lt.s32.totalorder %s968_s21, %s968_s21 }
   0x5   :  { %p975_p3 = por %p974_p2, %p973_p1 }
   0x7   :  { %p976_p4 = pnand %p975_p3, %p969_p0 }
   0x9   :  { %979 = shalt.err (!%p976_p4)  }
   0xa   :  { %s1048_s22 = smov [#allocation5]   ;;  %s980_s23 = scalar_lea.vmem %s14_s20, 16 }
   0xb   :  { %12 = dma.vmem_to_smem %s10_s17, 16, %s1048_s22, [#allocation4] }
   0xc   :  { %p981_p5 = scmp.ne.s32.totalorder %s14_s20, %s980_s23  ;;  %p985_p6 = scmp.lt.s32.totalorder %s14_s20, %s14_s20 }
   0xd   :  { %p986_p7 = scmp.lt.s32.totalorder %s980_s23, %s980_s23 }
   0xf   :  { %p987_p8 = por %p986_p7, %p985_p6 }
  0x11   :  { %p988_p9 = pnand %p987_p8, %p981_p5 }
  0x13   :  { %991 = shalt.err (!%p988_p9)  }
  0x14   :  { %s1049_s0 = smov [#allocation6]  }
  0x15   :  { %16 = dma.vmem_to_smem %s14_s20, 16, %s1049_s0, [#allocation4] }
  0x16   :  { %1030 = dma.done.wait [#allocation4], 32 }
  0x17   :  { %1031 = vsyncadd [#allocation4], 4294967264 }
  0x18   :  { %18 = sfence }
  0x19   :  { %19 = vsyncpa [#allocation8], 0  ;;  %s1088_s1 = smov 0   ;;  %s1090_s24 = smov 0  }
  0x1a   :  { %s1092_s25 = smov 0  }
  0x1b LB: > { %s843_s26 = sadd.s32 4294967295, %s1046_s25   ;;  %s34_s27 = sadd.s32 1, %s1042_s24  ;;  %s1046_s25 = sphi %s1092_s25, %s25_s25   ;;  %s1042_s24 = sphi %s1090_s24, %s1510_s24   ;;  %s1038_s1 = sphi %s1088_s1, %s1509_s1  }
  0x1c   : > { %p35_p10 = scmp.ge.s32.totalorder %s34_s27, 3  ;;  %p846_p11 = scmp.ge.s32.totalorder %s1046_s25, 1 }
  0x1d   : > { %p149_p12 = scmp.lt.s32.totalorder %s1046_s25, 4 }
  0x1e   : > { %s1512_s27 = smov (%p35_p10, %s34_s27), 0 }
  0x1f   : > { %p150_p13 = pnand %p846_p11, %p149_p12 }
  0x20   : > { %s847_s28 = sshll.u32 (!%p150_p13), %s1038_s1, 1  ;;  %s848_s29 = sshll.u32 (!%p150_p13), %s1038_s1, 5 }
  0x21   : > { %153 = sbr.rel (%p150_p13) target bundleno = 553 (0x229), region = 28  ;;  %p172_p0 = scmp.lt.s32.totalorder (!%p150_p13), %s847_s28, 5 }
  0x22   : > { %p177_p1 = scmp.lt.s32.totalorder (!%p150_p13), %s848_s29, 95  ;;  %p850_p2 = scmp.ne.s32.totalorder (!%p150_p13), %s1038_s1, 0 }
  0x28   : > { %s1514_s28 = smov (!%p172_p0, %s847_s28), 5  ;;  %s1516_s29 = smov (!%p177_p1, %s848_s29), 95 }
  0x29   : > { %s174_s6 = scalar_lea.vmem %s1494_s2, %s1514_s28  ;;  %s914_s7 = smul.u32 24, %s1516_s29  ;;  %vm192_vm0 = vcmask (!%p850_p2), 31744   ;;  %vm209_vm1 = vcmask (!%p850_p2), 7168   ;;  %v216_v0 = vlaneseq (!%p850_p2)  ;;  %v1050_v1 = vmov (!%p850_p2), 0.0  }
  0x2a   : > { %189 = sbr.rel (%p850_p2) target bundleno = 60 (0x3c), region = 32  ;;  %190 = vst [vmem:[#allocation7] sm:$0xff] (!%p850_p2), %v1050_v1  ;;  %191 = vst [vmem:[#allocation7 + $0x8] sm:$0xff] (!%p850_p2), %v1050_v1 }
  0x2b   : > { %s1120_s10 = scalar_lea.vmem %s1495_s3, %s914_s7  ;;  %194 = vst [vmem:[#allocation7 + $0x18] sm:$0xff] (!%p850_p2), %v1050_v1  ;;  %195 = vst [vmem:[#allocation7 + $0x20] sm:$0xff] (!%p850_p2), %v1050_v1  ;;  %v217_v2 = vshrl.u32 (!%p850_p2), %v216_v0, 7 }
  0x2c   : > { %197 = vst [vmem:[#allocation7 + $0x30] sm:$0xff] (!%p850_p2), %v1050_v1  ;;  %198 = vst [vmem:[#allocation7 + $0x38] sm:$0xff] (!%p850_p2), %v1050_v1 }
  0x2d   : > { %200 = vst [vmem:[#allocation7 + $0x48] sm:$0xff] (!%p850_p2), %v1050_v1  ;;  %201 = vst [vmem:[#allocation7 + $0x50] sm:$0xff] (!%p850_p2), %v1050_v1  ;;  %v218_v3 = vadd.s32 (!%p850_p2), 8, %v217_v2  ;;  %v219_v4 = vadd.s32 (!%p850_p2), 16, %v217_v2  ;;  %v220_v5 = vadd.s32 (!%p850_p2), 24, %v217_v2  ;;  %v221_v6 = vadd.s32 (!%p850_p2), 32, %v217_v2 }
  0x2e   : > { %203 = vst [vmem:[#allocation7 + $0x60] sm:$0xff] (!%p850_p2), %v1050_v1  ;;  %204 = vst [vmem:[#allocation7 + $0x68] sm:$0xff] (!%p850_p2), %v1050_v1  ;;  %v222_v7 = vadd.s32 (!%p850_p2), 40, %v217_v2 }
  0x2f   : > { %206 = vst [vmem:[#allocation7 + $0x78] sm:$0xff] (!%p850_p2), %v1050_v1  ;;  %207 = vst [vmem:[#allocation7 + $0x80] sm:$0xff] (!%p850_p2), %v1050_v1 }
  0x30   : > { %193 = vst.msk [vmem:[#allocation7 + $0x10] sm:$0xff] (!%p850_p2), %vm192_vm0, %v1050_v1  ;;  %196 = vst.msk [vmem:[#allocation7 + $0x28] sm:$0xff] (!%p850_p2), %vm192_vm0, %v1050_v1 }
  0x31   : > { %199 = vst.msk [vmem:[#allocation7 + $0x40] sm:$0xff] %vm192_vm0, %v1050_v1  ;;  %202 = vst.msk [vmem:[#allocation7 + $0x58] sm:$0xff] %vm192_vm0, %v1050_v1 }
  0x32   : > { %205 = vst.msk [vmem:[#allocation7 + $0x70] sm:$0xff] %vm192_vm0, %v1050_v1  ;;  %208 = vst.msk [vmem:[#allocation7 + $0x88] sm:$0xff] %vm192_vm0, %v1050_v1 }
  0x33   : > { %210 = vst.msk [vmem:[#allocation2] sm:$0xff] %vm209_vm1, %v1050_v1  ;;  %211 = vst.msk [vmem:[#allocation2 + $0x8] sm:$0xff] %vm209_vm1, %v1050_v1 }
  0x34   : > { %212 = vst.msk [vmem:[#allocation2 + $0x10] sm:$0xff] %vm209_vm1, %v1050_v1  ;;  %213 = vst.msk [vmem:[#allocation2 + $0x18] sm:$0xff] %vm209_vm1, %v1050_v1 }
  0x35   : > { %214 = vst.msk [vmem:[#allocation2 + $0x20] sm:$0xff] %vm209_vm1, %v1050_v1  ;;  %215 = vst.msk [vmem:[#allocation2 + $0x28] sm:$0xff] %vm209_vm1, %v1050_v1 }
  0x36   : > { %230 = vst [vmem:[#allocation3] sm:$0xff] %v217_v2  ;;  %231 = vst [vmem:[#allocation3 + $0x8] sm:$0xff] %v217_v2 }
  0x37   : > { %232 = vst [vmem:[#allocation3 + $0x10] sm:$0xff] %v218_v3  ;;  %233 = vst [vmem:[#allocation3 + $0x18] sm:$0xff] %v218_v3 }
  0x38   : > { %234 = vst [vmem:[#allocation3 + $0x20] sm:$0xff] %v219_v4  ;;  %235 = vst [vmem:[#allocation3 + $0x28] sm:$0xff] %v219_v4 }
  0x39   : > { %236 = vst [vmem:[#allocation3 + $0x30] sm:$0xff] %v220_v5  ;;  %237 = vst [vmem:[#allocation3 + $0x38] sm:$0xff] %v220_v5 }
  0x3a   : > { %238 = vst [vmem:[#allocation3 + $0x40] sm:$0xff] %v221_v6  ;;  %239 = vst [vmem:[#allocation3 + $0x48] sm:$0xff] %v221_v6 }
  0x3b   : > { %240 = vst [vmem:[#allocation3 + $0x50] sm:$0xff] %v222_v7  ;;  %241 = vst [vmem:[#allocation3 + $0x58] sm:$0xff] %v222_v7 }
  0x3c PF: > { %s242_s11 = sld [smem:[#allocation6 + %s1038_s1]] }
  0x3d   : > { %s244_s12 = sld [smem:[#allocation5 + %s1038_s1]] }
  0x42   : > { %p243_p3 = scmp.ge.s32.totalorder %s242_s11, 0 }
  0x43   : > { %p246_p4 = scmp.lt.s32.totalorder %s244_s12, 48 }
  0x45   : > { %p247_p5 = pnand %p246_p4, %p243_p3 }
  0x46   : > { %v358_v8 = vld [vmem:[%s1120_s10 + $0x8] sm:$0xff] (!%p247_p5)  ;;  %v361_v9 = vld [vmem:[%s1120_s10 + $0x20] sm:$0xff] (!%p247_p5)  ;;  %v360_v12 = vld [vmem:[%s1120_s10 + $0x18] sm:$0xff] (!%p247_p5)  ;;  %v264_v4 = vlaneseq (!%p247_p5) }
  0x47   : > { %250 = sbr.rel (%p247_p5) target bundleno = 371 (0x173), region = 36  ;;  %v357_v10 = vld [vmem:[%s1120_s10] sm:$0xff] (!%p247_p5)  ;;  %v454_v11 = vpack.c.bf16 (!%p247_p5), %v361_v9, %v358_v8  ;;  %v364_v13 = vld [vmem:[%s1120_s10 + $0x38] sm:$0xff] (!%p247_p5)  ;;  %v367_v14 = vld [vmem:[%s1120_s10 + $0x50] sm:$0xff] (!%p247_p5) }
  0x48   : > { %v453_v15 = vpack.c.bf16 (!%p247_p5), %v360_v12, %v357_v10  ;;  %v457_v16 = vpack.c.bf16 (!%p247_p5), %v367_v14, %v364_v13  ;;  %v363_v17 = vld [vmem:[%s1120_s10 + $0x30] sm:$0xff] (!%p247_p5)  ;;  %v366_v18 = vld [vmem:[%s1120_s10 + $0x48] sm:$0xff] (!%p247_p5)  ;;  %v373_v20 = vld [vmem:[%s1120_s10 + $0x80] sm:$0xff] (!%p247_p5) }
  0x49   : > { %v370_v19 = vld [vmem:[%s1120_s10 + $0x68] sm:$0xff] (!%p247_p5)  ;;  %501 = vmatprep.subr.bf16.mxu0 (!%p247_p5), %v454_v11  ;;  %v456_v21 = vpack.c.bf16 (!%p247_p5), %v366_v18, %v363_v17  ;;  %v369_v23 = vld [vmem:[%s1120_s10 + $0x60] sm:$0xff] (!%p247_p5)  ;;  %v372_v24 = vld [vmem:[%s1120_s10 + $0x78] sm:$0xff] (!%p247_p5)  ;;  %v265_v17 = vshrl.u32 (!%p247_p5), %v264_v4, 7 }
  0x4a   : > { %502 = vmatpush1.bf16.msra.mxu0 (!%p247_p5), %v453_v15  ;;  %v460_v22 = vpack.c.bf16 (!%p247_p5), %v373_v20, %v370_v19  ;;  %v376_v25 = vld [vmem:[%s1120_s10 + $0x98] sm:$0xff] (!%p247_p5)  ;;  %v379_v26 = vld [vmem:[%s1120_s10 + $0xb0] sm:$0xff] (!%p247_p5)  ;;  %v459_v27 = vpack.c.bf16 (!%p247_p5), %v372_v24, %v369_v23  ;;  %v378_v30 = vld [vmem:[%s1120_s10 + $0xa8] sm:$0xff] (!%p247_p5) }
  0x4b   : > { %503 = vmatprep.subr.bf16.mxu0 (!%p247_p5), %v457_v16  ;;  %v375_v28 = vld [vmem:[%s1120_s10 + $0x90] sm:$0xff] (!%p247_p5)  ;;  %v463_v29 = vpack.c.bf16 (!%p247_p5), %v379_v26, %v376_v25  ;;  %v410_v32 = vld [vmem:[%s1120_s10 + $0x1a8] sm:$0xff] (!%p247_p5)  ;;  %v385_v34 = vld [vmem:[%s1120_s10 + $0xe0] sm:$0xff] (!%p247_p5) }
  0x4c   : > { %v407_v31 = vld [vmem:[%s1120_s10 + $0x190] sm:$0xff] (!%p247_p5)  ;;  %v382_v33 = vld [vmem:[%s1120_s10 + $0xc8] sm:$0xff] (!%p247_p5)  ;;  %v462_v38 = vpack.c.bf16 (!%p247_p5), %v378_v30, %v375_v28  ;;  %v381_v39 = vld [vmem:[%s1120_s10 + $0xc0] sm:$0xff] (!%p247_p5) }
  0x4d   : > { %v479_v35 = vpack.c.bf16 (!%p247_p5), %v410_v32, %v407_v31  ;;  %v359_v36 = vld [vmem:[%s1120_s10 + $0x10] sm:$0xff] (!%p247_p5)  ;;  %v362_v37 = vld [vmem:[%s1120_s10 + $0x28] sm:$0xff] (!%p247_p5)  ;;  %v413_v41 = vld [vmem:[%s1120_s10 + $0x1c0] sm:$0xff] (!%p247_p5)  ;;  %v466_v43 = vpack.c.bf16 (!%p247_p5), %v385_v34, %v382_v33 }
  0x4e   : > { %504 = vmatpush1.bf16.msra.mxu0 %v456_v21  ;;  %v455_v40 = vpack.c.bf16 %v362_v37, %v359_v36  ;;  %v416_v42 = vld [vmem:[%s1120_s10 + $0x1d8] sm:$0xff]  ;;  %v365_v46 = vld [vmem:[%s1120_s10 + $0x40] sm:$0xff]  ;;  %v391_v49 = vld [vmem:[%s1120_s10 + $0x110] sm:$0xff] }
  0x4f   : > { %505 = vmatprep.subr.bf16.mxu0 %v460_v22  ;;  %880 = vmatprep.subr.bf16.mxu1 %v479_v35  ;;  %v384_v44 = vld [vmem:[%s1120_s10 + $0xd8] sm:$0xff]  ;;  %v482_v45 = vpack.c.bf16 %v416_v42, %v413_v41  ;;  %v419_v51 = vld [vmem:[%s1120_s10 + $0x1f0] sm:$0xff]  ;;  %v422_v52 = vld [vmem:[%s1120_s10 + $0x208] sm:$0xff]  ;;  %v270_v41 = vsub.s32 1, %v265_v17 }
  0x50   : > { %v368_v47 = vld [vmem:[%s1120_s10 + $0x58] sm:$0xff]  ;;  %881 = vmatpush3.bf16.msra.mxu1 %v455_v40  ;;  %v465_v53 = vpack.c.bf16 %v384_v44, %v381_v39  ;;  %v387_v54 = vld [vmem:[%s1120_s10 + $0xf0] sm:$0xff]  ;;  %v485_v55 = vpack.c.bf16 %v422_v52, %v419_v51  ;;  %v374_v57 = vld [vmem:[%s1120_s10 + $0x88] sm:$0xff]  ;;  %v266_v40 = vsub.s32 0, %v265_v17 }
  0x51   : > { %v388_v48 = vld [vmem:[%s1120_s10 + $0xf8] sm:$0xff]  ;;  %v458_v50 = vpack.c.bf16 %v368_v47, %v365_v46  ;;  %882 = vmatprep.subr.bf16.mxu1 %v482_v45  ;;  %v371_v56 = vld [vmem:[%s1120_s10 + $0x70] sm:$0xff]  ;;  %v390_v59 = vld [vmem:[%s1120_s10 + $0x108] sm:$0xff] }
  0x52   : > { %506 = vmatpush1.bf16.msra.mxu0 %v459_v27  ;;  %v469_v58 = vpack.c.bf16 %v391_v49, %v388_v48  ;;  %v425_v60 = vld [vmem:[%s1120_s10 + $0x220] sm:$0xff]  ;;  %v428_v61 = vld [vmem:[%s1120_s10 + $0x238] sm:$0xff]  ;;  %v394_v62 = vld [vmem:[%s1120_s10 + $0x128] sm:$0xff]  ;;  %v461_v0 = vpack.c.bf16 %v374_v57, %v371_v56  ;;  %v468_v5 = vpack.c.bf16 %v390_v59, %v387_v54 }
  0x53   : > { %507 = vmatprep.subr.bf16.mxu0 %v463_v29  ;;  %v397_v63 = vld [vmem:[%s1120_s10 + $0x140] sm:$0xff]  ;;  %v488_v1 = vpack.c.bf16 %v428_v61, %v425_v60  ;;  %v380_v3 = vld [vmem:[%s1120_s10 + $0xb8] sm:$0xff]  ;;  %v431_v6 = vld [vmem:[%s1120_s10 + $0x250] sm:$0xff] }
  0x54   : > { %883 = vmatpush3.bf16.msra.mxu1 %v458_v50  ;;  %v377_v2 = vld [vmem:[%s1120_s10 + $0xa0] sm:$0xff]  ;;  %v434_v7 = vld [vmem:[%s1120_s10 + $0x268] sm:$0xff]  ;;  %v472_v8 = vpack.c.bf16 %v397_v63, %v394_v62  ;;  %v396_v10 = vld [vmem:[%s1120_s10 + $0x138] sm:$0xff] }
  0x55   : > { %884 = vmatprep.subr.bf16.mxu1 %v485_v55  ;;  %v393_v9 = vld [vmem:[%s1120_s10 + $0x120] sm:$0xff]  ;;  %v400_v11 = vld [vmem:[%s1120_s10 + $0x158] sm:$0xff]  ;;  %v403_v12 = vld [vmem:[%s1120_s10 + $0x170] sm:$0xff]  ;;  %v464_v13 = vpack.c.bf16 %v380_v3, %v377_v2  ;;  %v491_v14 = vpack.c.bf16 %v434_v7, %v431_v6 }
  0x56   : > { %508 = vmatpush1.bf16.msra.mxu0 %v462_v38  ;;  %v383_v15 = vld [vmem:[%s1120_s10 + $0xd0] sm:$0xff]  ;;  %v386_v16 = vld [vmem:[%s1120_s10 + $0xe8] sm:$0xff]  ;;  %v471_v18 = vpack.c.bf16 %v396_v10, %v393_v9  ;;  %v437_v19 = vld [vmem:[%s1120_s10 + $0x280] sm:$0xff]  ;;  %v475_v21 = vpack.c.bf16 %v403_v12, %v400_v11  ;;  %v1051_v9 = vmov 0.0   ;;  %v1052_v11 = vmov 1.0|1.0  }
  0x57   : > { %509 = vmatprep.subr.bf16.mxu0 %v466_v43  ;;  %v440_v20 = vld [vmem:[%s1120_s10 + $0x298] sm:$0xff]  ;;  %v399_v22 = vld [vmem:[%s1120_s10 + $0x150] sm:$0xff]  ;;  %v402_v23 = vld [vmem:[%s1120_s10 + $0x168] sm:$0xff]  ;;  %v467_v28 = vpack.c.bf16 %v386_v16, %v383_v15 }
  0x58   : > { %885 = vmatpush3.bf16.msra.mxu1 %v461_v0  ;;  %v406_v24 = vld [vmem:[%s1120_s10 + $0x188] sm:$0xff]  ;;  %v409_v25 = vld [vmem:[%s1120_s10 + $0x1a0] sm:$0xff]  ;;  %v1197_v27 = vld [vmem:[%s1120_s10 + $0x198] sm:$0xff]  ;;  %v494_v37 = vpack.c.bf16 %v440_v20, %v437_v19  ;;  %v474_v42 = vpack.c.bf16 %v402_v23, %v399_v22 }
  0x59   : > { %886 = vmatprep.subr.bf16.mxu1 %v488_v1  ;;  %v1194_v26 = vld [vmem:[%s1120_s10 + $0x180] sm:$0xff]  ;;  %v1200_v29 = vld [vmem:[%s1120_s10 + $0x1b8] sm:$0xff]  ;;  %v1203_v30 = vld [vmem:[%s1120_s10 + $0x1d0] sm:$0xff]  ;;  %v478_v46 = vpack.c.bf16 %v409_v25, %v406_v24 }
  0x5a   : > { %510 = vmatpush1.bf16.msra.mxu0 %v465_v53  ;;  %v1206_v31 = vld [vmem:[%s1120_s10 + $0x1b0] sm:$0xff]  ;;  %v1209_v32 = vld [vmem:[%s1120_s10 + $0x1c8] sm:$0xff]  ;;  %v1215_v34 = vld [vmem:[%s1120_s10 + $0x200] sm:$0xff]  ;;  %v477_v54 = vpack.c.bf16 %v1197_v27, %v1194_v26  ;;  %v481_v61 = vpack.c.bf16 %v1203_v30, %v1200_v29 }
  0x5b   : > { %511 = vmatprep.subr.bf16.mxu0 %v469_v58  ;;  %v1212_v33 = vld [vmem:[%s1120_s10 + $0x1e8] sm:$0xff]  ;;  %v1218_v35 = vld [vmem:[%s1120_s10 + $0x1e0] sm:$0xff]  ;;  %v1221_v36 = vld [vmem:[%s1120_s10 + $0x1f8] sm:$0xff]  ;;  %v480_v62 = vpack.c.bf16 %v1209_v32, %v1206_v31 }
  0x5c   : > { %887 = vmatpush3.bf16.msra.mxu1 %v464_v13  ;;  %v389_v38 = vld [vmem:[%s1120_s10 + $0x100] sm:$0xff]  ;;  %v392_v39 = vld [vmem:[%s1120_s10 + $0x118] sm:$0xff]  ;;  %v443_v43 = vld [vmem:[%s1120_s10 + $0x2b0] sm:$0xff]  ;;  %v484_v63 = vpack.c.bf16 %v1215_v34, %v1212_v33  ;;  %v483_v0 = vpack.c.bf16 %v1221_v36, %v1218_v35 }
  0x5d   : > { %888 = vmatprep.subr.bf16.mxu1 %v491_v14  ;;  %v446_v44 = vld [vmem:[%s1120_s10 + $0x2c8] sm:$0xff]  ;;  %v1228_v45 = vld [vmem:[%s1120_s10 + $0x130] sm:$0xff]  ;;  %v1232_v48 = vld [vmem:[%s1120_s10 + $0x2e0] sm:$0xff]  ;;  %v470_v50 = vpack.c.bf16 %v392_v39, %v389_v38 }
  0x5e   : > { %512 = vmatpush1.bf16.msra.mxu0 %v468_v5  ;;  %v398_v47 = vld [vmem:[%s1120_s10 + $0x148] sm:$0xff]  ;;  %v1235_v49 = vld [vmem:[%s1120_s10 + $0x2f8] sm:$0xff]  ;;  %v1238_v51 = vld [vmem:[%s1120_s10 + $0x160] sm:$0xff]  ;;  %v497_v55 = vpack.c.bf16 %v446_v44, %v443_v43 }
  0x5f   : > { %513 = vmatprep.subr.bf16.mxu0 %v472_v8  ;;  %v1241_v52 = vld [vmem:[%s1120_s10 + $0x178] sm:$0xff]  ;;  %v251_v53 = vld [vmem:[%s174_s6] sm:$0x3]  ;;  %v255_v57 = vld [vmem:[#allocation3 + $0x18] sm:$0xff]  ;;  %v473_v2 = vpack.c.bf16 %v398_v47, %v1228_v45  ;;  %v500_v4 = vpack.c.bf16 %v1235_v49, %v1232_v48 }
  0x60   : > { %889 = vmatpush3.bf16.msra.mxu1 %v467_v28  ;;  %v253_v56 = vld [vmem:[#allocation3 + $0x8] sm:$0xff]  ;;  %v1250_v58 = vrot.slane %v251_v53, %v266_v40  ;;  %v1252_v59 = vrot.slane %v251_v53, %v270_v41  ;;  %v1254_v60 = vld [vmem:[#allocation3] sm:$0xff]  ;;  %v1264_v1 = vld [vmem:[#allocation3 + $0x10] sm:$0xff]  ;;  %v476_v5 = vpack.c.bf16 %v1241_v52, %v1238_v51 }
  0x61   : > { %890 = vmatprep.subr.bf16.mxu1 %v494_v37  ;;  %v257_v3 = vld [vmem:[#allocation3 + $0x28] sm:$0xff]  ;;  %v259_v7 = vld [vmem:[#allocation3 + $0x38] sm:$0xff]  ;;  %v1284_v8 = vld [vmem:[#allocation3 + $0x20] sm:$0xff] }
  0x62   : > { %514 = vmatpush1.bf16.msra.mxu0 %v471_v18  ;;  %vm273_vm2 = vcmp.eq.s32.totalorder %v1252_v59, %v253_v56  ;;  %vm275_vm3 = vcmp.eq.s32.totalorder %v1252_v59, %v255_v57  ;;  %vm272_vm4 = vcmp.eq.s32.totalorder %v1250_v58, %v1254_v60  ;;  %vm277_vm6 = vcmp.eq.s32.totalorder %v1252_v59, %v257_v3  ;;  %v1294_v12 = vld [vmem:[#allocation3 + $0x30] sm:$0xff]  ;;  %v1298_v13 = vld [vmem:[#allocation3 + $0x48] sm:$0xff]  ;;  %v263_v16 = vld [vmem:[#allocation3 + $0x58] sm:$0xff] }
  0x63   : > { %515 = vmatprep.subr.bf16.mxu0 %v475_v21  ;;  %vm1279_vm5 = vmpackc.low %vm275_vm3, %vm273_vm2  ;;  %v284_v10 = vsel %vm272_vm4, 1.0, %v1051_v9  ;;  %vm274_vm7 = vcmp.eq.s32.totalorder %v1250_v58, %v1264_v1  ;;  %vm276_vm8 = vcmp.eq.s32.totalorder %v1250_v58, %v1284_v8  ;;  %v289_v14 = vsel %vm277_vm6, 1.0, %v1051_v9  ;;  %v1310_v17 = vld [vmem:[#allocation3 + $0x40] sm:$0xff]  ;;  %v1318_v20 = vld [vmem:[#allocation3 + $0x50] sm:$0xff] }
  0x64   : > { %891 = vmatpush3.bf16.msra.mxu1 %v470_v50  ;;  %864 = vmatprep.mubr.msk.bf16.mxu1 %vm1279_vm5, %v1052_v11  ;;  %v285_v15 = vsel %vm273_vm2, 1.0, %v1051_v9  ;;  %vm279_vm9 = vcmp.eq.s32.totalorder %v1252_v59, %v259_v7  ;;  %vm278_vm10 = vcmp.eq.s32.totalorder %v1250_v58, %v1294_v12  ;;  %v288_v18 = vsel %vm276_vm8, 1.0, %v1051_v9  ;;  %v424_v23 = vld [vmem:[%s1120_s10 + $0x218] sm:$0xff]  ;;  %v427_v24 = vld [vmem:[%s1120_s10 + $0x230] sm:$0xff]  ;;  %v426_v38 = vld [vmem:[%s1120_s10 + $0x228] sm:$0xff] }
  0x65   : > { %892 = vmatprep.subr.bf16.mxu1 %v497_v55  ;;  %852 = vmatprep.mubr.msk.bf16.mxu0 %vm1279_vm5, %v1052_v11  ;;  %v302_v19 = vadd.f32 %v285_v15, %v284_v10  ;;  %vm281_vm11 = vcmp.eq.s32.totalorder %v1252_v59, %v1298_v13  ;;  %vm283_vm12 = vcmp.eq.s32.totalorder %v1252_v59, %v263_v16  ;;  %v290_v22 = vsel %vm278_vm10, 1.0, %v1051_v9  ;;  %v423_v37 = vld [vmem:[%s1120_s10 + $0x210] sm:$0xff]  ;;  %v430_v39 = vld [vmem:[%s1120_s10 + $0x248] sm:$0xff]  ;;  %v433_v40 = vld [vmem:[%s1120_s10 + $0x260] sm:$0xff] }
  0x66   : > { %516 = vmatpush1.bf16.msra.mxu0 %v474_v42  ;;  %v308_v21 = vadd.f32 %v289_v14, %v288_v18  ;;  %vm280_vm13 = vcmp.eq.s32.totalorder %v1250_v58, %v1310_v17  ;;  %v291_v25 = vsel %vm279_vm9, 1.0, %v1051_v9  ;;  %v286_v26 = vsel %vm274_vm7, 1.0, %v1051_v9  ;;  %vm1357_vm15 = vmpackc.low %vm274_vm7, %vm272_vm4  ;;  %v429_v47 = vld [vmem:[%s1120_s10 + $0x240] sm:$0xff]  ;;  %v432_v48 = vld [vmem:[%s1120_s10 + $0x258] sm:$0xff] }
  0x67   : > { %517 = vmatprep.subr.bf16.mxu0 %v478_v46  ;;  %303 = vadd.xlane.f32.xlu0 %v302_v19  ;;  %v287_v27 = vsel %vm275_vm3, 1.0, %v1051_v9  ;;  %vm282_vm14 = vcmp.eq.s32.totalorder %v1250_v58, %v1318_v20  ;;  %v311_v28 = vadd.f32 %v291_v25, %v290_v22  ;;  %v295_v31 = vsel %vm283_vm12, 1.0, %v1051_v9  ;;  %vm1365_vm0 = vmpackc.low %vm279_vm9, %vm277_vm6  ;;  %v436_v49 = vld [vmem:[%s1120_s10 + $0x278] sm:$0xff]  ;;  %v439_v50 = vld [vmem:[%s1120_s10 + $0x290] sm:$0xff] }
  0x68   : > { %893 = vmatpush3.bf16.msra.mxu1 %v473_v2  ;;  %309 = vadd.xlane.f32.xlu1 %v308_v21  ;;  %v305_v29 = vadd.f32 %v287_v27, %v286_v26  ;;  %v294_v30 = vsel %vm282_vm14, 1.0, %v1051_v9  ;;  %v292_v32 = vsel %vm280_vm13, 1.0, %v1051_v9  ;;  %v293_v33 = vsel %vm281_vm11, 1.0, %v1051_v9  ;;  %v435_v51 = vld [vmem:[%s1120_s10 + $0x270] sm:$0xff]  ;;  %v438_v52 = vld [vmem:[%s1120_s10 + $0x288] sm:$0xff]  ;;  %vm1392_vm1 = vmpackc.low %vm278_vm10, %vm276_vm8 }
  0x69   : > { %894 = vmatprep.subr.bf16.mxu1 %v500_v4  ;;  %v487_v34 = vpack.c.bf16 %v427_v24, %v424_v23  ;;  %v314_v42 = vadd.f32 %v293_v33, %v292_v32  ;;  %v317_v44 = vadd.f32 %v295_v31, %v294_v30  ;;  %v486_v45 = vpack.c.bf16 %v426_v38, %v423_v37  ;;  %v442_v53 = vld [vmem:[%s1120_s10 + $0x2a8] sm:$0xff]  ;;  %vm1401_vm2 = vmpackc.low %vm283_vm12, %vm281_vm11  ;;  %v447_v2 = vld [vmem:[%s1120_s10 + $0x2d0] sm:$0xff] }
  0x6a   : > { %518 = vmatpush1.bf16.msra.mxu0 %v477_v54  ;;  %v490_v46 = vpack.c.bf16 %v433_v40, %v430_v39  ;;  %v489_v35 = vpack.c.bf16 %v432_v48, %v429_v47  ;;  %v493_v36 = vpack.c.bf16 %v439_v50, %v436_v49  ;;  %v445_v54 = vld [vmem:[%s1120_s10 + $0x2c0] sm:$0xff]  ;;  %v492_v57 = vpack.c.bf16 %v438_v52, %v435_v51  ;;  %v450_v3 = vld [vmem:[%s1120_s10 + $0x2e8] sm:$0xff]  ;;  %vm861_vm3 = vmpackc.low %vm282_vm14, %vm280_vm13 }
  0x6b   : > { %519 = vmatprep.subr.bf16.mxu0 %v481_v61  ;;  %306 = vadd.xlane.f32.xlu0 %v305_v29  ;;  %v496_v60 = vpack.c.bf16 %v445_v54, %v442_v53  ;;  %v441_v61 = vld [vmem:[%s1120_s10 + $0x2a0] sm:$0xff]  ;;  %v498_v4 = vpack.c.bf16 %v450_v3, %v447_v2  ;;  %vm326_vm4 = vcmask 7168   ;;  %v297_v10 = vld [vmem:[#allocation2 + $0x8] sm:$0xff]  ;;  %v299_v12 = vld [vmem:[#allocation2 + $0x18] sm:$0xff]  ;;  %vm641_vm5 = vcmask 31744  }
  0x6c   : > { %895 = vmatpush3.bf16.msra.mxu1 %v476_v5  ;;  %312 = vadd.xlane.f32.xlu1 %v311_v28  ;;  %v296_v58 = vld [vmem:[#allocation2] sm:$0xff]  ;;  %v298_v5 = vld [vmem:[#allocation2 + $0x10] sm:$0xff]  ;;  %v338_v27 = vld [vmem:[#allocation7 + $0x28] sm:$0xff] }
  0x6d   : > { %v300_v17 = vld [vmem:[#allocation2 + $0x20] sm:$0xff]  ;;  %v341_v33 = vld [vmem:[#allocation7 + $0x40] sm:$0xff]  ;;  %v344_v39 = vld [vmem:[#allocation7 + $0x58] sm:$0xff] }
  0x6e   : > { %520 = vmatpush1.bf16.msra.mxu0 %v480_v62  ;;  %v444_v62 = vld [vmem:[%s1120_s10 + $0x2b8] sm:$0xff]  ;;  %v335_v23 = vld [vmem:[#allocation7 + $0x10] sm:$0xff]  ;;  %v336_v54 = vld [vmem:[#allocation7 + $0x18] sm:$0xff] }
  0x6f   : > { %521 = vmatprep.subr.bf16.mxu0 %v484_v63  ;;  %866 = vmatmul.mubr.msk.bf16.vlgmr.msra.gmra.mrb[0].mxu1 %vm1357_vm15, %v1052_v11  ;;  %v448_v63 = vld [vmem:[%s1120_s10 + $0x2d8] sm:$0xff]  ;;  %v495_v59 = vpack.c.bf16 %v444_v62, %v441_v61  ;;  %v340_v2 = vld [vmem:[#allocation7 + $0x38] sm:$0xff] }
  0x70   : > { %868 = vmatprep.mubr.msk.bf16.mxu1 %vm1365_vm0, %v1052_v11  ;;  %315 = vadd.xlane.f32.xlu0 %v314_v42  ;;  %v350_v49 = vld [vmem:[#allocation7 + $0x88] sm:$0xff] }
  0x71   : > { %318 = vadd.xlane.f32.xlu1 %v317_v44  ;;  %v334_v52 = vld [vmem:[#allocation7 + $0x8] sm:$0xff] }
  0x72   : > { %522 = vmatpush1.bf16.msra.mxu0 %v483_v0  ;;  %v451_v0 = vld [vmem:[%s1120_s10 + $0x2f0] sm:$0xff] }
  0x73   : > { %523 = vmatprep.subr.bf16.mxu0 %v487_v34  ;;  %v499_v1 = vpack.c.bf16 %v451_v0, %v448_v63 }
  0x76   : > { %524 = vmatpush1.bf16.msra.mxu0 %v486_v45  ;;  %v347_v45 = vld [vmem:[#allocation7 + $0x70] sm:$0xff] }
  0x77   : > { %525 = vmatprep.subr.bf16.mxu0 %v490_v46  ;;  %870 = vmatmul.mubr.msk.bf16.gmra.mrb[4].mxu1 %vm1392_vm1, %v1052_v11 }
  0x78   : > { %872 = vmatprep.mubr.msk.bf16.mxu1 %vm1401_vm2, %v1052_v11 }
  0x7a   : > { %526 = vmatpush1.bf16.msra.mxu0 %v489_v35  ;;  %v333_v35 = vld [vmem:[#allocation7] sm:$0xff] }
  0x7b   : > { %527 = vmatprep.subr.bf16.mxu0 %v493_v36 }
  0x7e   : > { %528 = vmatpush1.bf16.msra.mxu0 %v492_v57 }
  0x7f   : > { %529 = vmatprep.subr.bf16.mxu0 %v496_v60  ;;  %874 = vmatmul.mubr.msk.bf16.gmra.mrb[8].mxu1 %vm861_vm3, %v1052_v11  ;;  %v337_v60 = vld [vmem:[#allocation7 + $0x20] sm:$0xff] }
  0x82   : > { %530 = vmatpush1.bf16.msra.mxu0 %v495_v59 }
  0x83   : > { %531 = vmatprep.subr.bf16.mxu0 %v499_v1  ;;  %v339_v1 = vld [vmem:[#allocation7 + $0x30] sm:$0xff] }
  0x86   : > { %532 = vmatpush1.bf16.msra.mxu0 %v498_v4  ;;  %v342_v4 = vld [vmem:[#allocation7 + $0x48] sm:$0xff] }
  0x89   : > { %854 = vmatmul.mubr.msk.bf16.vlgmr.msra.gmra.mrb[0].mxu0 %vm1357_vm15, %v1052_v11 }
  0x8a   : > { %856 = vmatprep.mubr.msk.bf16.mxu0 %vm1365_vm0, %v1052_v11 }
  0x91   : > { %858 = vmatmul.mubr.msk.bf16.gmra.mrb[4].mxu0 %vm1392_vm1, %v1052_v11 }
  0x92   : > { %860 = vmatprep.mubr.msk.bf16.mxu0 %vm1401_vm2, %v1052_v11 }
  0x99   : > { %862 = vmatmul.mubr.msk.bf16.gmra.mrb[8].mxu0 %vm861_vm3, %v1052_v11  ;;  %v301_v11 = vld [vmem:[#allocation2 + $0x28] sm:$0xff] }
  0xf4   : > { %v304_v6 = vpop.xlane.xlu0 %303 }
  0xf5   : > { %v310_v7 = vpop.xlane.xlu1 %309  ;;  %v320_v8 = vadd.f32 %v304_v6, %v296_v58  ;;  %v343_v6 = vld [vmem:[#allocation7 + $0x50] sm:$0xff] }
  0xf6   : > { %v322_v9 = vadd.f32 %v310_v7, %v298_v5 }
  0xf7   : > { %327 = vst.msk [vmem:[#allocation2] sm:$0xff] %vm326_vm4, %v320_v8 }
  0xf8   : > { %329 = vst.msk [vmem:[#allocation2 + $0x10] sm:$0xff] %vm326_vm4, %v322_v9  ;;  %v307_v13 = vpop.xlane.xlu0 %306 }
  0xf9   : > { %v313_v14 = vpop.xlane.xlu1 %312  ;;  %v321_v15 = vadd.f32 %v307_v13, %v297_v10  ;;  %v345_v13 = vld [vmem:[#allocation7 + $0x60] sm:$0xff] }
  0xfa   : > { %v323_v16 = vadd.f32 %v313_v14, %v299_v12  ;;  %v346_v14 = vld [vmem:[#allocation7 + $0x68] sm:$0xff] }
  0xfb   : > { %328 = vst.msk [vmem:[#allocation2 + $0x8] sm:$0xff] %vm326_vm4, %v321_v15 }
  0xfc   : > { %330 = vst.msk [vmem:[#allocation2 + $0x18] sm:$0xff] %vm326_vm4, %v323_v16  ;;  %v348_v16 = vld [vmem:[#allocation7 + $0x78] sm:$0xff] }
  0xfd   : > { %v316_v18 = vpop.xlane.xlu0 %315 }
  0xfe   : > { %v319_v19 = vpop.xlane.xlu1 %318  ;;  %v324_v20 = vadd.f32 %v316_v18, %v300_v17  ;;  %v349_v18 = vld [vmem:[#allocation7 + $0x80] sm:$0xff] }
  0xff   : > { %v325_v21 = vadd.f32 %v319_v19, %v301_v11 }
 0x100   : > { %331 = vst.msk [vmem:[#allocation2 + $0x20] sm:$0xff] %vm326_vm4, %v324_v20 }
 0x101   : > { %332 = vst.msk [vmem:[#allocation2 + $0x28] sm:$0xff] %vm326_vm4, %v325_v21 }
 0x142   : > { %v896_v22 = vpop.f32.mrb[0].mxu1 }
 0x143   : > { %v897_v24 = vpop.f32.mrb[1].mxu1 }
 0x144   : > { %v898_v25 = vadd.f32 %v897_v24, %v896_v22  ;;  %v899_v26 = vpop.f32.mrb[2].mxu1 }
 0x145   : > { %v900_v28 = vpop.f32.mrb[3].mxu1 }
 0x146   : > { %v623_v29 = vadd.f32 %v898_v25, %v335_v23  ;;  %v901_v30 = vadd.f32 %v900_v28, %v899_v26 }
 0x148   : > { %642 = vst.msk [vmem:[#allocation7 + $0x10] sm:$0xff] %vm641_vm5, %v623_v29  ;;  %v626_v31 = vadd.f32 %v901_v30, %v338_v27 }
 0x14a   : > { %645 = vst.msk [vmem:[#allocation7 + $0x28] sm:$0xff] %vm641_vm5, %v626_v31  ;;  %v902_v32 = vpop.f32.mrb[4].mxu1 }
 0x14b   : > { %v903_v34 = vpop.f32.mrb[5].mxu1 }
 0x14c   : > { %v904_v37 = vadd.f32 %v903_v34, %v902_v32  ;;  %v905_v38 = vpop.f32.mrb[6].mxu1 }
 0x14d   : > { %v906_v40 = vpop.f32.mrb[7].mxu1 }
 0x14e   : > { %v629_v41 = vadd.f32 %v904_v37, %v341_v33  ;;  %v907_v42 = vadd.f32 %v906_v40, %v905_v38 }
 0x150   : > { %648 = vst.msk [vmem:[#allocation7 + $0x40] sm:$0xff] %vm641_vm5, %v629_v41  ;;  %v632_v43 = vadd.f32 %v907_v42, %v344_v39 }
 0x152   : > { %651 = vst.msk [vmem:[#allocation7 + $0x58] sm:$0xff] %vm641_vm5, %v632_v43  ;;  %v908_v44 = vpop.f32.mrb[8].mxu1 }
 0x153   : > { %v909_v46 = vpop.f32.mrb[9].mxu1 }
 0x154   : > { %v910_v47 = vadd.f32 %v909_v46, %v908_v44  ;;  %v911_v48 = vpop.f32.mrb[10].mxu1 }
 0x155   : > { %v912_v50 = vpop.f32.mrb[11].mxu1 }
 0x156   : > { %v635_v36 = vadd.f32 %v910_v47, %v347_v45  ;;  %v913_v51 = vadd.f32 %v912_v50, %v911_v48 }
 0x158   : > { %654 = vst.msk [vmem:[#allocation7 + $0x70] sm:$0xff] %vm641_vm5, %v635_v36  ;;  %v638_v55 = vadd.f32 %v913_v51, %v350_v49 }
 0x15a   : > { %657 = vst.msk [vmem:[#allocation7 + $0x88] sm:$0xff] %vm641_vm5, %v638_v55 }
 0x15c   : > { %v535_v53 = vpop.f32.mrb[0].mxu0 }
 0x15d   : > { %v621_v56 = vadd.f32 %v535_v53, %v333_v35  ;;  %v537_v57 = vpop.f32.mrb[1].mxu0 }
 0x15e   : > { %v622_v61 = vadd.f32 %v537_v57, %v334_v52  ;;  %v539_v62 = vpop.f32.mrb[2].mxu0 }
 0x15f   : > { %639 = vst [vmem:[#allocation7] sm:$0xff] %v621_v56  ;;  %v624_v63 = vadd.f32 %v539_v62, %v336_v54  ;;  %v541_v0 = vpop.f32.mrb[3].mxu0 }
 0x160   : > { %640 = vst [vmem:[#allocation7 + $0x8] sm:$0xff] %v622_v61  ;;  %v625_v59 = vadd.f32 %v541_v0, %v337_v60 }
 0x161   : > { %643 = vst [vmem:[#allocation7 + $0x18] sm:$0xff] %v624_v63 }
 0x162   : > { %644 = vst [vmem:[#allocation7 + $0x20] sm:$0xff] %v625_v59 }
 0x164   : > { %v545_v3 = vpop.f32.mrb[4].mxu0 }
 0x165   : > { %v627_v58 = vadd.f32 %v545_v3, %v339_v1  ;;  %v547_v5 = vpop.f32.mrb[5].mxu0 }
 0x166   : > { %v628_v7 = vadd.f32 %v547_v5, %v340_v2  ;;  %v549_v8 = vpop.f32.mrb[6].mxu0 }
 0x167   : > { %646 = vst [vmem:[#allocation7 + $0x30] sm:$0xff] %v627_v58  ;;  %v630_v9 = vadd.f32 %v549_v8, %v342_v4  ;;  %v551_v10 = vpop.f32.mrb[7].mxu0 }
 0x168   : > { %647 = vst [vmem:[#allocation7 + $0x38] sm:$0xff] %v628_v7  ;;  %v631_v12 = vadd.f32 %v551_v10, %v343_v6 }
 0x169   : > { %649 = vst [vmem:[#allocation7 + $0x48] sm:$0xff] %v630_v9 }
 0x16a   : > { %650 = vst [vmem:[#allocation7 + $0x50] sm:$0xff] %v631_v12 }
 0x16c   : > { %v555_v15 = vpop.f32.mrb[8].mxu0 }
 0x16d   : > { %v633_v17 = vadd.f32 %v555_v15, %v345_v13  ;;  %v557_v11 = vpop.f32.mrb[9].mxu0 }
 0x16e   : > { %v634_v19 = vadd.f32 %v557_v11, %v346_v14  ;;  %v559_v20 = vpop.f32.mrb[10].mxu0 }
 0x16f   : > { %652 = vst [vmem:[#allocation7 + $0x60] sm:$0xff] %v633_v17  ;;  %v636_v21 = vadd.f32 %v559_v20, %v348_v16  ;;  %v561_v22 = vpop.f32.mrb[11].mxu0 }
 0x170   : > { %653 = vst [vmem:[#allocation7 + $0x68] sm:$0xff] %v634_v19  ;;  %v637_v23 = vadd.f32 %v561_v22, %v349_v18 }
 0x171   : > { %655 = vst [vmem:[#allocation7 + $0x78] sm:$0xff] %v636_v21 }
 0x172   : > { %656 = vst [vmem:[#allocation7 + $0x80] sm:$0xff] %v637_v23 }
 0x173 PF: > { %p875_p6 = scmp.ne.s32.totalorder %s1038_s1, 2 }
 0x174   : > { %v664_v24 = vld [vmem:[#allocation2 + $0x10] sm:$0xff] (!%p875_p6)  ;;  %v662_v25 = vld [vmem:[#allocation2] sm:$0xff] (!%p875_p6)  ;;  %v665_v26 = vld [vmem:[#allocation2 + $0x18] sm:$0xff] (!%p875_p6)  ;;  %v1053_v27 = vmov (!%p875_p6), 0   ;;  %vm754_vm6 = vcmask (!%p875_p6), 31744  }
 0x175   : > { %661 = sbr.rel (%p875_p6) target bundleno = 527 (0x20f), region = 40  ;;  %955 = vset.pattern.permute.xlu1 (!%p875_p6), %v1053_v27  ;;  %954 = vset.pattern.permute.xlu0 (!%p875_p6), %v1053_v27  ;;  %v670_v28 = vmax.f32 (!%p875_p6), %v664_v24, 1.0  ;;  %v668_v29 = vmax.f32 (!%p875_p6), %v662_v25, 1.0  ;;  %v671_v30 = vmax.f32 (!%p875_p6), %v665_v26, 1.0  ;;  %v663_v31 = vld [vmem:[#allocation2 + $0x8] sm:$0xff] (!%p875_p6)  ;;  %v666_v34 = vld [vmem:[#allocation2 + $0x20] sm:$0xff] (!%p875_p6) }
 0x176   : > { %v669_v32 = vmax.f32 (!%p875_p6), %v663_v31, 1.0  ;;  %v667_v33 = vld [vmem:[#allocation2 + $0x28] sm:$0xff] (!%p875_p6)  ;;  %v672_v38 = vmax.f32 (!%p875_p6), %v666_v34, 1.0  ;;  %v692_v45 = vld [vmem:[#allocation7 + $0x30] sm:$0xff] (!%p875_p6)  ;;  %v694_v47 = vld [vmem:[#allocation7 + $0x40] sm:$0xff] (!%p875_p6) }
 0x177   : > { %956 = vrcp.f32 (!%p875_p6), %v670_v28  ;;  %v673_v37 = vmax.f32 (!%p875_p6), %v667_v33, 1.0  ;;  %v693_v46 = vld [vmem:[#allocation7 + $0x38] sm:$0xff] (!%p875_p6)  ;;  %v686_v48 = vld [vmem:[#allocation7] sm:$0xff] (!%p875_p6)  ;;  %v687_v49 = vld [vmem:[#allocation7 + $0x8] sm:$0xff] (!%p875_p6) }
 0x178   : > { %958 = vrcp.f32 (!%p875_p6), %v668_v29  ;;  %v688_v50 = vld [vmem:[#allocation7 + $0x10] sm:$0xff] (!%p875_p6)  ;;  %v695_v57 = vld [vmem:[#allocation7 + $0x48] sm:$0xff] (!%p875_p6)  ;;  %v697_v61 = vld [vmem:[#allocation7 + $0x58] sm:$0xff] (!%p875_p6) }
 0x179   : > { %960 = vrcp.f32 (!%p875_p6), %v671_v30  ;;  %v696_v60 = vld [vmem:[#allocation7 + $0x50] sm:$0xff] (!%p875_p6)  ;;  %v689_v62 = vld [vmem:[#allocation7 + $0x18] sm:$0xff] (!%p875_p6)  ;;  %v690_v63 = vld [vmem:[#allocation7 + $0x20] sm:$0xff] (!%p875_p6) }
 0x17a   : > { %962 = vrcp.f32 (!%p875_p6), %v669_v32  ;;  %v691_v0 = vld [vmem:[#allocation7 + $0x28] sm:$0xff] (!%p875_p6)  ;;  %v701_v7 = vld [vmem:[#allocation7 + $0x78] sm:$0xff] (!%p875_p6)  ;;  %v702_v8 = vld [vmem:[#allocation7 + $0x80] sm:$0xff] (!%p875_p6) }
 0x17b   : > { %964 = vrcp.f32 (!%p875_p6), %v673_v37  ;;  %v703_v9 = vld [vmem:[#allocation7 + $0x88] sm:$0xff] (!%p875_p6)  ;;  %v698_v10 = vld [vmem:[#allocation7 + $0x60] sm:$0xff] (!%p875_p6)  ;;  %v700_v13 = vld [vmem:[#allocation7 + $0x70] sm:$0xff] (!%p875_p6) }
 0x17c   : > { %966 = vrcp.f32 %v672_v38  ;;  %v699_v12 = vld [vmem:[#allocation7 + $0x68] sm:$0xff] }
 0x181   : > { %v957_v39 = vpop.eup %956 }
 0x182   : > { %v959_v40 = vpop.eup %958  ;;  %716 = vperm.xlu1 %955, %v957_v39  }
 0x183   : > { %v961_v41 = vpop.eup %960  ;;  %706 = vperm.xlu0 %954, %v959_v40  }
 0x184   : > { %v963_v42 = vpop.eup %962 }
 0x185   : > { %v965_v43 = vpop.eup %964 }
 0x186   : > { %721 = vperm.xlu1 %955, %v961_v41   ;;  %v967_v44 = vpop.eup %966 }
 0x187   : > { %711 = vperm.xlu0 %954, %v963_v42  }
 0x18a   : > { %731 = vperm.xlu1 %955, %v965_v43  }
 0x18b   : > { %726 = vperm.xlu0 %954, %v967_v44  }
 0x201   : > { %v717_v35 = vpop.permute.xlu1 %716 }
 0x202   : > { %v740_v36 = vmul.f32 %v717_v35, %v692_v45  ;;  %v741_v51 = vmul.f32 %v717_v35, %v693_v46  ;;  %v742_v52 = vmul.f32 %v717_v35, %v694_v47  ;;  %v707_v53 = vpop.permute.xlu0 %706 }
 0x203   : > { %v734_v54 = vmul.f32 %v707_v53, %v686_v48  ;;  %v735_v55 = vmul.f32 %v707_v53, %v687_v49  ;;  %v736_v56 = vmul.f32 %v707_v53, %v688_v50 }
 0x204   : > { %759 = vst [vmem:[#allocation7 + $0x30] sm:$0xff] %v740_v36  ;;  %760 = vst [vmem:[#allocation7 + $0x38] sm:$0xff] %v741_v51 }
 0x205   : > { %761 = vst.msk [vmem:[#allocation7 + $0x40] sm:$0xff] %vm754_vm6, %v742_v52  ;;  %752 = vst [vmem:[#allocation7] sm:$0xff] %v734_v54  ;;  %v722_v59 = vpop.permute.xlu1 %721 }
 0x206   : > { %753 = vst [vmem:[#allocation7 + $0x8] sm:$0xff] %v735_v55  ;;  %755 = vst.msk [vmem:[#allocation7 + $0x10] sm:$0xff] %vm754_vm6, %v736_v56  ;;  %v743_v1 = vmul.f32 %v722_v59, %v695_v57  ;;  %v744_v2 = vmul.f32 %v722_v59, %v696_v60  ;;  %v745_v3 = vmul.f32 %v722_v59, %v697_v61  ;;  %v712_v4 = vpop.permute.xlu0 %711 }
 0x207   : > { %v737_v58 = vmul.f32 %v712_v4, %v689_v62  ;;  %v738_v5 = vmul.f32 %v712_v4, %v690_v63  ;;  %v739_v6 = vmul.f32 %v712_v4, %v691_v0 }
 0x208   : > { %762 = vst [vmem:[#allocation7 + $0x48] sm:$0xff] %v743_v1  ;;  %763 = vst [vmem:[#allocation7 + $0x50] sm:$0xff] %v744_v2 }
 0x209   : > { %764 = vst.msk [vmem:[#allocation7 + $0x58] sm:$0xff] %vm754_vm6, %v745_v3  ;;  %756 = vst [vmem:[#allocation7 + $0x18] sm:$0xff] %v737_v58  ;;  %v732_v14 = vpop.permute.xlu1 %731 }
 0x20a   : > { %757 = vst [vmem:[#allocation7 + $0x20] sm:$0xff] %v738_v5  ;;  %758 = vst.msk [vmem:[#allocation7 + $0x28] sm:$0xff] %vm754_vm6, %v739_v6  ;;  %v749_v15 = vmul.f32 %v732_v14, %v701_v7  ;;  %v750_v16 = vmul.f32 %v732_v14, %v702_v8  ;;  %v751_v17 = vmul.f32 %v732_v14, %v703_v9  ;;  %v727_v11 = vpop.permute.xlu0 %726 }
 0x20b   : > { %v746_v18 = vmul.f32 %v727_v11, %v698_v10  ;;  %v747_v19 = vmul.f32 %v727_v11, %v699_v12  ;;  %v748_v20 = vmul.f32 %v727_v11, %v700_v13 }
 0x20c   : > { %768 = vst [vmem:[#allocation7 + $0x78] sm:$0xff] %v749_v15  ;;  %769 = vst [vmem:[#allocation7 + $0x80] sm:$0xff] %v750_v16 }
 0x20d   : > { %770 = vst.msk [vmem:[#allocation7 + $0x88] sm:$0xff] %vm754_vm6, %v751_v17  ;;  %765 = vst [vmem:[#allocation7 + $0x60] sm:$0xff] %v746_v18 }
 0x20e   : > { %766 = vst [vmem:[#allocation7 + $0x68] sm:$0xff] %v747_v19  ;;  %767 = vst.msk [vmem:[#allocation7 + $0x70] sm:$0xff] %vm754_vm6, %v748_v20 }
 0x20f PF: > { %p1458_p7 = scmp.eq.s32.totalorder %s843_s26, 2  ;;  %s1054_s16 = smov [#allocation7]  }
 0x210   : > { %s781_s17 = sshll.u32 %s1054_s16, 4  ;;  %s782_s17 = int_to_ptr.vmem [resolvable:$true] %s781_s17 }
 0x211   : > { %s992_s18 = scalar_lea.vmem %s782_s17, 2304  ;;  %p999_p11 = scmp.lt.s32.totalorder %s782_s17, %s782_s17 }
 0x212   : > { %p993_p8 = scmp.ne.s32.totalorder %s782_s17, %s992_s18  ;;  %p1000_p12 = scmp.lt.s32.totalorder %s992_s18, %s992_s18 }
 0x214   : > { %p994_p9 = pnand %p993_p8, %p1458_p7  ;;  %p1001_p13 = por %p1000_p12, %p999_p11 }
 0x216   : > { %p995_p10 = pneg %p994_p9 }
 0x218   : > { %p1002_p0 = pnand %p1001_p13, %p995_p10 }
 0x21a   : > { %1005 = shalt.err (!%p1002_p0)
}
 0x21b   : > { %s1006_s21 = scalar_lea.hbm %s1496_s4, 2304 }
 0x21c   : > { %p1007_p1 = scmp.ne.s32.totalorder %s1496_s4, %s1006_s21  ;;  %p1012_p4 = scmp.lt.u32.totalorder %s1006_s21, %s1496_s4 }
 0x21e   : > { %p1008_p2 = pnand %p1007_p1, %p1458_p7 }
 0x220   : > { %p1009_p3 = pneg %p1008_p2 }
 0x222   : > { %p1014_p5 = pnand %p1012_p4, %p1009_p3 }
 0x224   : > { %1017 = shalt.err (!%p1014_p5)
}
 0x225   : > { %s1055_s26 = smov 384   ;;  %s1056_s28 = smov 24  }
 0x226   : > { %916 = dma.vmem_to_hbm [thread:$0]  (%p1458_p7), %s782_s17, 2304, %s1496_s4, [#allocation8], %s1055_s26, %s1055_s26, %s1056_s28  }
 0x227   : > { %1033 = dma.done.wait (%p1458_p7), [#allocation8], 2304  }
 0x228   : > { %1035 = vsyncadd (%p1458_p7), [#allocation8], 4294964992 }
 0x229 PF: > { %s25_s25 = sadd.s32 1, %s1046_s25   ;;  %s1509_s1 = smov %s1042_s24 }
 0x22a   : > { %p22_p6 = scmp.ge.s32.totalorder %s25_s25, 5   ;;  %s1510_s24 = smov %s1512_s27 }
 0x22c   :  { %24 = sbr.rel (!%p22_p6) target bundleno = 27 (0x1b), region = 71 }
 0x233   :  { %797 = vsyncpa [#allocation8], 1 }
 0x234   :  { %799 = vsyncpa [#allocation8 + $0x1], 1 }

</bundles_post_ra>
